<compile_context>
chip_gen: v5e
topology: v5e:2x2
jax: 0.10.0
libtpu: 0.0.40
codegen_flags: <defaults>
</compile_context>

<pallas_src>
import jax
import jax.numpy as jnp
from jax.experimental import pallas as pl
from jax.experimental.pallas import tpu as pltpu


def _round_up(x, m):
    return (x + m - 1) // m * m


def _linear_col_kernel(x_ref, w_ref, b_ref, o_ref):
    """One (tile_B, d_l) block of x -> one (tile_B, 1) output column.

    x_ref: (tile_B, d_l) VMEM    w_ref: (1, d_l) VMEM (lane-major weight row)
    b_ref: (1,) SMEM scalar      o_ref: (tile_B, 1) VMEM
    """
    # Multiply in the (promoted) input dtype, accumulate the lane-reduce in f32.
    prod = (x_ref[...] * w_ref[...]).astype(jnp.float32)   # (tile_B, d_l)
    s = jnp.sum(prod, axis=-1, keepdims=True)               # (tile_B, 1) f32
    o_ref[...] = (s + b_ref[0]).astype(o_ref.dtype)


def _choose_tile_b(batch, d_l, x_itemsize):
    """Sublane-aligned batch tile, VMEM-budgeted with lane padding accounted."""
    if batch <= 8:
        return batch                       # one full-array block (always legal)
    # A (tile_B, d_l) block is lane-padded to 128, so per-row VMEM is
    # round_up(d_l, 128) * itemsize bytes, NOT d_l * itemsize.
    row_bytes = _round_up(d_l, 128) * x_itemsize
    # ~4 MiB of x per buffer -> ~8 MiB double-buffered (+ tiny weight/output),
    # comfortably inside v5e's 16 MiB default scoped VMEM and v7x's 64 MiB VMEM.
    budget_rows = max(128, ((4 << 20) // row_bytes) // 128 * 128)
    tile = min(budget_rows, (batch // 8) * 8)          # multiple of 8, <= batch
    # Prefer >= 2 grid steps for larger batches so v7x megacore splits the work.
    if tile >= batch and batch >= 256:
        tile = min(tile, _round_up(pl.cdiv(batch, 2), 128))
    return tile


def classifier_forward(x, weight_row, bias):
    """Pallas equivalent of nn.Linear(d_l, 1): x [B, d_l] -> [B, 1].

    weight_row: [1, d_l]  (same layout as PyTorch's nn.Linear weight)
    bias:       [1]       (scalar, kept in SMEM)
    """
    B, d_l = x.shape
    out_dtype = x.dtype

    tile_B = _choose_tile_b(B, d_l, jnp.dtype(x.dtype).itemsize)
    num_tiles = pl.cdiv(B, tile_B)

    bytes_accessed = (
        B * d_l * jnp.dtype(x.dtype).itemsize
        + d_l * jnp.dtype(weight_row.dtype).itemsize
        + jnp.dtype(bias.dtype).itemsize
        + B * jnp.dtype(out_dtype).itemsize
    )

    return pl.pallas_call(
        _linear_col_kernel,
        out_shape=jax.ShapeDtypeStruct((B, 1), out_dtype),
        grid=(num_tiles,),
        in_specs=[
            pl.BlockSpec((tile_B, d_l), lambda i: (i, 0)),      # x rows tile
            pl.BlockSpec((1, d_l), lambda i: (0, 0)),           # weight row (const)
            pl.BlockSpec(memory_space=pltpu.MemorySpace.SMEM),  # scalar bias
        ],
        out_specs=pl.BlockSpec((tile_B, 1), lambda i: (i, 0)),  # output column
        compiler_params=pltpu.CompilerParams(
            dimension_semantics=("parallel",),
            vmem_limit_bytes=32 << 20,
        ),
        cost_estimate=pl.CostEstimate(
            flops=2 * B * d_l,
            transcendentals=0,
            bytes_accessed=bytes_accessed,
        ),
    )(x, weight_row, bias)


if __name__ == "__main__":
    # config1.d_l is unavailable here; pick a small, consistent hidden size.
    d_l = 32
    B = 8

    key = jax.random.PRNGKey(0)
    kx, kw, kb = jax.random.split(key, 3)

    # Deterministic params mimicking nn.Linear's uniform(-1/sqrt(d_l), 1/sqrt(d_l)).
    bound = 1.0 / (d_l ** 0.5)
    x = jax.random.normal(kx, (B, d_l), dtype=jnp.float32)
    weight_row = jax.random.uniform(kw, (1, d_l), dtype=jnp.float32,
                                    minval=-bound, maxval=bound)
    bias = jax.random.uniform(kb, (1,), dtype=jnp.float32,
                              minval=-bound, maxval=bound)

    out = classifier_forward(x, weight_row, bias)
    jax.block_until_ready(out)

    # Reference check against plain JAX (same semantics as PyTorch Linear).
    ref = x @ weight_row.T + bias
    assert out.shape == (B, 1)
    assert jnp.allclose(out, ref, atol=1e-5, rtol=1e-5)

    print("KERNEL_OK")
</pallas_src>

<mosaic_0001>
module attributes {stable_mosaic.version = 11 : i64} {
  func.func @_linear_col_kernel(%arg0: i32, %arg1: memref<8x32xf32, #tpu.memory_space<vmem>>, %arg2: memref<1x32xf32, #tpu.memory_space<vmem>>, %arg3: memref<1xf32, #tpu.memory_space<smem>>, %arg4: memref<8x1xf32, #tpu.memory_space<vmem>>) attributes {dimension_semantics = [#tpu.dimension_semantics<parallel>], iteration_bounds = array<i64: 1>, scalar_prefetch = 0 : i64, scratch_operands = 0 : i64, tpu.core_type = #tpu.core_type<tc>, window_params = [{transform_indices = @transform_0, window_bounds = array<i64: 8, 32>}, {pipeline_mode = #tpu.pipeline_mode<synchronous>, transform_indices = @transform_1, window_bounds = array<i64: 1, 32>}, {transform_indices = @transform_2, window_bounds = array<i64: 1>}, {transform_indices = @transform_3, window_bounds = array<i64: 8, 1>}]} {
    %c0 = arith.constant 0 : index
    %c0_0 = arith.constant 0 : index
    %0 = vector.load %arg1[%c0, %c0_0] : memref<8x32xf32, #tpu.memory_space<vmem>>, vector<8x32xf32>
    %c0_1 = arith.constant 0 : index
    %c0_2 = arith.constant 0 : index
    %1 = vector.load %arg2[%c0_1, %c0_2] : memref<1x32xf32, #tpu.memory_space<vmem>>, vector<1x32xf32>
    %2 = vector.broadcast %1 : vector<1x32xf32> to vector<8x32xf32>
    %3 = arith.mulf %0, %2 : vector<8x32xf32>
    %cst = arith.constant dense<0.000000e+00> : vector<8xf32>
    %4 = vector.multi_reduction <add>, %3, %cst [1] : vector<8x32xf32> to vector<8xf32>
    %5 = vector.shape_cast %4 : vector<8xf32> to vector<8x1xf32>
    %c0_3 = arith.constant 0 : index
    %6 = memref.load %arg3[%c0_3] : memref<1xf32, #tpu.memory_space<smem>>
    %7 = vector.broadcast %6 : f32 to vector<8x1xf32>
    %8 = arith.addf %5, %7 : vector<8x1xf32>
    %c0_4 = arith.constant 0 : index
    %c0_5 = arith.constant 0 : index
    %9 = vector.load %arg4[%c0_4, %c0_5] : memref<8x1xf32, #tpu.memory_space<vmem>>, vector<8x1xf32>
    tpu.vector_store %arg4[%c0_4, %c0_5], %8 {strides = array<i32>} : memref<8x1xf32, #tpu.memory_space<vmem>>, vector<8x1xf32>,
    return
  }
  func.func @transform_0(%arg0: i32) -> (i32, i32) {
    %c0_i32 = arith.constant 0 : i32
    %c0_i32_0 = arith.constant 0 : i32
    return %arg0, %c0_i32 : i32, i32
  }
  func.func @transform_1(%arg0: i32) -> (i32, i32) {
    %c0_i32 = arith.constant 0 : i32
    %c0_i32_0 = arith.constant 0 : i32
    %c0_i32_1 = arith.constant 0 : i32
    return %c0_i32, %c0_i32_0 : i32, i32
  }
  func.func @transform_2(%arg0: i32) -> i32 {
    %c0_i32 = arith.constant 0 : i32
    %c0_i32_0 = arith.constant 0 : i32
    return %c0_i32 : i32
  }
  func.func @transform_3(%arg0: i32) -> (i32, i32) {
    %c0_i32 = arith.constant 0 : i32
    %c0_i32_0 = arith.constant 0 : i32
    return %arg0, %c0_i32 : i32, i32
  }
}

</mosaic_0001>

<bundles_post_ra>
// kernel: tpu_custom_call.1
= control target key start
LH: loop header
LB: loop body
LE: loop exit
PB: predicated region body
PF: predicated region fallthrough
CT: control target
= control target key end

     0   :  { %9 = vsyncpa [#allocation4], 0  ;;  %s77_s15 = smov [#allocation3]   ;;  %s110_s0 = inlined_call_operand.hbm [shape: f32[8,32], index: 0, kind: input, shape index: {}]   ;;  %s111_s1 = inlined_call_operand.vmem [shape: f32[1,32], index: 1, kind: input, shape index: {}]   ;;  %s112_s2 = inlined_call_operand.<no memory space> [shape: f32[1], index: 2, kind: input, shape index: {}]   ;;  %s113_s3 = inlined_call_operand.vmem [shape: f32[8,1], index: 3, kind: output, shape index: {}]  }
   0x1   :  { %s15_s14 = sshll.u32 %s110_s0, 4  ;;  %s17_s16 = sshll.u32 %s77_s15, 4  ;;  %s16_s14 = int_to_ptr.hbm [resolvable:$true] %s15_s14  ;;  %s18_s16 = int_to_ptr.vmem [resolvable:$true] %s17_s16 }
   0x2   :  { %20 = dma.hbm_to_vmem [thread:$0]  %s16_s14, 128, %s18_s16, [#allocation4]  }
   0x3   :  { %75 = dma.done.wait [#allocation4], 128  }
   0x4   :  { %76 = vsyncadd [#allocation4], 4294967168  ;;  %v29_v0 = vld [vmem:[#allocation3] sm:$0xff]  ;;  %vm35_vm0 = vcmask 261120   ;;  %v40_v4 = vstv %s112_s2  ;;  %vm42_vm1 = vcmask 7168  }
   0x5   :  { %v50_v1 = vld [vmem:[%s111_s1] ss:$0 sm:$0xff] }
   0x6   :  { %v34_v2 = vmul.f32 %v50_v1, %v29_v0 }
   0x8   :  { %v36_v3 = vsel %vm35_vm0, %v34_v2, 0.0 }
   0x9   :  { %37 = vadd.xlane.f32.xlu0 %v36_v3 }
  0x7c   :  { %v38_v5 = vpop.xlane.xlu0 %37 }
  0x7d   :  { %v41_v6 = vadd.f32 %v40_v4, %v38_v5 }
  0x7f   :  { %43 = vst.msk [vmem:[%s113_s3] sm:$0xff] %vm42_vm1, %v41_v6 }
  0x80   :  { %48 = vsyncpa [#allocation4], 1 }

</bundles_post_ra>
